<compile_context>
chip_gen: v7x
topology: tpu7x:2x2x1
jax: 0.10.0
libtpu: 0.0.40
codegen_flags: <defaults>
</compile_context>

<pallas_src>
import functools

import jax
import jax.numpy as jnp
import numpy as np
from jax.experimental import pallas as pl
from jax.experimental.pallas import tpu as pltpu


def _round_up(n, m):
    return ((n + m - 1) // m) * m


def _round_down(n, m):
    return max(m, (n // m) * m)


def _choose_tile_rows(num_rows, lane_width):
    """Rows of the (packed) output view processed per grid step."""
    # Keep the double-buffered f32 output block well inside scoped VMEM on all
    # generations (v7x is the smallest: 32 MiB scoped / 64 MiB physical).
    vmem_cap_rows = _round_down((8 * 1024 * 1024) // (2 * lane_width * 4), 8)
    # ~2 MiB f32 blocks amortize the ~0.35 us per-grid-step overhead.
    target_rows = _round_down((512 * 1024) // lane_width, 8)
    # At least 2 grid steps when possible so the "parallel" grid axis can be
    # sharded across the two TensorCores of a v7x chip.
    two_step_rows = max(8, _round_up(-(-num_rows // 2), 8))
    return max(8, min(vmem_cap_rows, target_rows, two_step_rows))


def _gfp_kernel(x_ref, w_ref, p_ref, o_ref, *, r, embed_dim):
    # x_ref: (tile_g, r)        packed time steps (r original rows per vreg row)
    # w_ref: (1, r*embed_dim)   2*pi*W, doubled ([W, W]) and tiled r times
    # p_ref: (1, r*embed_dim)   phase: 0 for the sin half, pi/2 for the cos half
    # o_ref: (tile_g, r*embed_dim)
    tile_g = x_ref.shape[0]
    x = x_ref[...]
    if r == 1:
        xp = jnp.broadcast_to(x, (tile_g, embed_dim))
    else:
        # Expand each of the r packed rows across its embed_dim lane chunk.
        # Lane broadcasts + one lane-concat ride in VPU/XLU slots and hide under
        # the VALU-heavy sin evaluation.
        xp = jnp.concatenate(
            [jnp.broadcast_to(x[:, k:k + 1], (tile_g, embed_dim)) for k in range(r)],
            axis=-1,
        )
    # Single full-width lane-dense store; cos(t) is obtained as sin(t + pi/2),
    # so there is no sin/cos concatenate and no partial-width stores.
    o_ref[...] = jnp.sin(xp * w_ref[...] + p_ref[...])


def gaussian_fourier_projection(x, W):
    """x: (N,) times; W: (embed_dim//2,) frozen Gaussian weights.

    Returns (N, embed_dim) float32, equal (within f32 rounding) to
    torch.cat([sin(2*pi*x*W), cos(2*pi*x*W)], dim=-1).
    """
    x = x.astype(jnp.float32)
    W = W.astype(jnp.float32)
    N = int(x.shape[0])
    half = int(W.shape[0])
    embed_dim = 2 * half

    # Doubled weights (sin half + cos half) with 2*pi folded in, and the phase
    # row implementing cos(t) = sin(t + pi/2).
    w_full = jnp.concatenate([W, W]) * np.float32(2.0 * np.pi)            # (embed_dim,)
    phase_full = jnp.concatenate(
        [jnp.zeros((half,), jnp.float32),
         jnp.full((half,), np.float32(np.pi / 2.0), jnp.float32)])        # (embed_dim,)

    # Lane-dense packing factor: r consecutive output rows per 128-lane row.
    if embed_dim < 128 and 128 % embed_dim == 0 and N % (128 // embed_dim) == 0:
        r = 128 // embed_dim
    else:
        r = 1  # embed_dim already lane-aligned, or packing not applicable

    num_rows = N // r                     # rows of the packed view
    lane_width = r * embed_dim            # 128 when packed, embed_dim otherwise

    w_tiled = jnp.tile(w_full, (r,)).reshape(1, lane_width)
    p_tiled = jnp.tile(phase_full, (r,)).reshape(1, lane_width)
    x_view = x.reshape(num_rows, r)       # free row-major reshape of a tiny array

    tile_g = _choose_tile_rows(num_rows, lane_width)
    grid = (pl.cdiv(num_rows, tile_g),)   # ragged last block: OOB rows masked

    cost = pl.CostEstimate(
        flops=2 * N * embed_dim,                 # one mul + one add per element
        transcendentals=N * embed_dim,           # one sin per output element
        bytes_accessed=4 * (N + 2 * lane_width + N * embed_dim),
    )

    out_packed = pl.pallas_call(
        functools.partial(_gfp_kernel, r=r, embed_dim=embed_dim),
        out_shape=jax.ShapeDtypeStruct((num_rows, lane_width), jnp.float32),
        grid_spec=pltpu.PrefetchScalarGridSpec(
            num_scalar_prefetch=0,
            grid=grid,
            in_specs=[
                pl.BlockSpec((tile_g, r), lambda i: (i, 0)),
                pl.BlockSpec((1, lane_width), lambda i: (0, 0)),
                pl.BlockSpec((1, lane_width), lambda i: (0, 0)),
            ],
            out_specs=pl.BlockSpec((tile_g, lane_width), lambda i: (i, 0)),
        ),
        compiler_params=pltpu.CompilerParams(
            dimension_semantics=("parallel",),   # row tiles are independent
        ),
        cost_estimate=cost,
    )(x_view, w_tiled, p_tiled)

    # Free row-major reshape back to the module's (N, embed_dim) layout.
    return out_packed.reshape(N, embed_dim)


def _check(kW, kx, N, embed_dim, scale=30.0):
    W = jax.random.normal(kW, (embed_dim // 2,), dtype=jnp.float32) * scale
    x = jax.random.uniform(kx, (N,), dtype=jnp.float32)

    out = jax.block_until_ready(gaussian_fourier_projection(x, W))
    assert out.shape == (N, embed_dim)

    # float64 ground truth on host (exact math on the given f32 inputs).
    x64 = np.asarray(x, dtype=np.float64)
    W64 = np.asarray(W, dtype=np.float64)
    proj = 2.0 * np.pi * x64[:, None] * W64[None, :]
    ref = np.concatenate([np.sin(proj), np.cos(proj)], axis=-1)

    # |proj| reaches a few hundred at scale=30, so a ~2-ulp f32 argument
    # perturbation (2*pi folding + pi/2 phase) moves sin/cos by up to ~2e-4.
    np.testing.assert_allclose(np.asarray(out, dtype=np.float64), ref,
                               rtol=1e-5, atol=5e-4)


if __name__ == "__main__":
    keys = jax.random.split(jax.random.PRNGKey(0), 8)

    # Module-default small shape (diffusion time embedding): packed lane-dense
    # path (r=4), single grid step.
    _check(keys[0], keys[1], N=8, embed_dim=32)

    # Larger batch, embed_dim=64: packed path (r=2), 2 grid steps with a ragged
    # (masked) final block — exercises the no-pad / no-slice path.
    _check(keys[2], keys[3], N=1000, embed_dim=64)

    # embed_dim >= 128: already lane-aligned (r=1), ragged row count.
    _check(keys[4], keys[5], N=37, embed_dim=256)

    # N not divisible by the packing factor: falls back to the unpacked path.
    _check(keys[6], keys[7], N=7, embed_dim=32)

    print("KERNEL_OK")
</pallas_src>

<mosaic_0001>
module attributes {stable_mosaic.version = 11 : i64} {
  func.func @_gfp_kernel(%arg0: i32, %arg1: memref<8x4xf32, #tpu.memory_space<vmem>>, %arg2: memref<1x128xf32, #tpu.memory_space<vmem>>, %arg3: memref<1x128xf32, #tpu.memory_space<vmem>>, %arg4: memref<8x128xf32, #tpu.memory_space<vmem>>) attributes {dimension_semantics = [#tpu.dimension_semantics<parallel>], iteration_bounds = array<i64: 1>, scalar_prefetch = 0 : i64, scratch_operands = 0 : i64, tpu.core_type = #tpu.core_type<tc>, window_params = [{transform_indices = @transform_0, window_bounds = array<i64: 8, 4>}, {pipeline_mode = #tpu.pipeline_mode<synchronous>, transform_indices = @transform_1, window_bounds = array<i64: 1, 128>}, {pipeline_mode = #tpu.pipeline_mode<synchronous>, transform_indices = @transform_2, window_bounds = array<i64: 1, 128>}, {transform_indices = @transform_3, window_bounds = array<i64: 8, 128>}]} {
    %c0 = arith.constant 0 : index
    %c0_0 = arith.constant 0 : index
    %0 = vector.load %arg1[%c0, %c0_0] : memref<8x4xf32, #tpu.memory_space<vmem>>, vector<8x4xf32>
    %1 = vector.extract_strided_slice %0 {offsets = [0, 0], sizes = [8, 1], strides = [1, 1]} : vector<8x4xf32> to vector<8x1xf32>
    %2 = vector.shape_cast %1 : vector<8x1xf32> to vector<8x1xf32>
    %3 = vector.broadcast %2 : vector<8x1xf32> to vector<8x32xf32>
    %4 = vector.extract_strided_slice %0 {offsets = [0, 1], sizes = [8, 1], strides = [1, 1]} : vector<8x4xf32> to vector<8x1xf32>
    %5 = vector.shape_cast %4 : vector<8x1xf32> to vector<8x1xf32>
    %6 = vector.broadcast %5 : vector<8x1xf32> to vector<8x32xf32>
    %7 = vector.extract_strided_slice %0 {offsets = [0, 2], sizes = [8, 1], strides = [1, 1]} : vector<8x4xf32> to vector<8x1xf32>
    %8 = vector.shape_cast %7 : vector<8x1xf32> to vector<8x1xf32>
    %9 = vector.broadcast %8 : vector<8x1xf32> to vector<8x32xf32>
    %10 = vector.extract_strided_slice %0 {offsets = [0, 3], sizes = [8, 1], strides = [1, 1]} : vector<8x4xf32> to vector<8x1xf32>
    %11 = vector.shape_cast %10 : vector<8x1xf32> to vector<8x1xf32>
    %12 = vector.broadcast %11 : vector<8x1xf32> to vector<8x32xf32>
    %13 = tpu.concatenate %3, %6, %9, %12 in 1 : vector<8x32xf32>, vector<8x32xf32>, vector<8x32xf32>, vector<8x32xf32> -> vector<8x128xf32>
    %c0_1 = arith.constant 0 : index
    %c0_2 = arith.constant 0 : index
    %14 = vector.load %arg2[%c0_1, %c0_2] : memref<1x128xf32, #tpu.memory_space<vmem>>, vector<1x128xf32>
    %15 = vector.broadcast %14 : vector<1x128xf32> to vector<8x128xf32>
    %16 = arith.mulf %13, %15 : vector<8x128xf32>
    %c0_3 = arith.constant 0 : index
    %c0_4 = arith.constant 0 : index
    %17 = vector.load %arg3[%c0_3, %c0_4] : memref<1x128xf32, #tpu.memory_space<vmem>>, vector<1x128xf32>
    %18 = vector.broadcast %17 : vector<1x128xf32> to vector<8x128xf32>
    %19 = arith.addf %16, %18 : vector<8x128xf32>
    %20 = math.sin %19 : vector<8x128xf32>
    %c0_5 = arith.constant 0 : index
    %c0_6 = arith.constant 0 : index
    %21 = vector.load %arg4[%c0_5, %c0_6] : memref<8x128xf32, #tpu.memory_space<vmem>>, vector<8x128xf32>
    tpu.vector_store %arg4[%c0_5, %c0_6], %20 {strides = array<i32>} : memref<8x128xf32, #tpu.memory_space<vmem>>, vector<8x128xf32>,
    return
  }
  func.func @transform_0(%arg0: i32) -> (i32, i32) {
    %c0_i32 = arith.constant 0 : i32
    %c0_i32_0 = arith.constant 0 : i32
    return %arg0, %c0_i32 : i32, i32
  }
  func.func @transform_1(%arg0: i32) -> (i32, i32) {
    %c0_i32 = arith.constant 0 : i32
    %c0_i32_0 = arith.constant 0 : i32
    %c0_i32_1 = arith.constant 0 : i32
    return %c0_i32, %c0_i32_0 : i32, i32
  }
  func.func @transform_2(%arg0: i32) -> (i32, i32) {
    %c0_i32 = arith.constant 0 : i32
    %c0_i32_0 = arith.constant 0 : i32
    %c0_i32_1 = arith.constant 0 : i32
    return %c0_i32, %c0_i32_0 : i32, i32
  }
  func.func @transform_3(%arg0: i32) -> (i32, i32) {
    %c0_i32 = arith.constant 0 : i32
    %c0_i32_0 = arith.constant 0 : i32
    return %arg0, %c0_i32 : i32, i32
  }
}

</mosaic_0001>

<bundles_post_ra>
// kernel: tpu_custom_call.1
= control target key start
LH: loop header
LB: loop body
LE: loop exit
PB: predicated region body
PF: predicated region fallthrough
CT: control target
= control target key end

     0   :  { %8 = vsyncpa [#allocation3], 0  ;;  %s363_s0 = inlined_call_operand.hbm [shape: f32[2,4], index: 0, kind: input, shape index: {}]   ;;  %s364_s1 = inlined_call_operand.vmem [shape: f32[1,128], index: 1, kind: input, shape index: {}]   ;;  %s365_s2 = inlined_call_operand.vmem [shape: f32[1,128], index: 2, kind: input, shape index: {}]   ;;  %s366_s3 = inlined_call_operand.hbm [shape: f32[2,128], index: 3, kind: output, shape index: {}]  }
   0x1   :  { %9 = vsyncpa [#allocation4], 0 }
   0x2   :  { %14 = vsyncadd [#allocation3], 96  ;;  %s272_s12 = smov [#allocation2]   ;;  %s224_s16 = scalar_lea.hbm %s363_s0, 32 }
   0x3   :  { %s15_s13 = sshll.u32 %s272_s12, 4  ;;  %p225_p0 = scmp.ne.s32.totalorder %s363_s0, %s224_s16  ;;  %s16_s13 = int_to_ptr.vmem [resolvable:$true] %s15_s13 }
   0x4   :  { %p228_p1 = scmp.lt.u32.totalorder %s224_s16, %s363_s0 }
   0x6   :  { %p230_p2 = pnand %p228_p1, %p225_p0 }
   0x8   :  { %233 = shalt.err (!%p230_p2)
}
   0x9   :  { %s234_s21 = scalar_lea.vmem %s16_s13, 32  ;;  %s238_s22 = scalar_lea.vmem %s16_s13, 128 }
   0xa   :  { %p235_p3 = scmp.ne.s32.totalorder %s16_s13, %s234_s21  ;;  %p239_p4 = scmp.lt.s32.totalorder %s16_s13, %s16_s13 }
   0xb   :  { %p240_p5 = scmp.lt.s32.totalorder %s238_s22, %s234_s21 }
   0xd   :  { %p241_p6 = por %p240_p5, %p239_p4 }
   0xf   :  { %p242_p7 = pnand %p241_p6, %p235_p3 }
  0x11   :  { %245 = shalt.err (!%p242_p7)
}
  0x12   :  { %s273_s23 = smov 32   ;;  %s274_s24 = smov 2  }
  0x13   :  { %21 = dma.hbm_to_vmem [thread:$0]  %s363_s0, 32, %s16_s13, [#allocation3], %s273_s23, %s273_s23, %s274_s24  }
  0x14   :  { %268 = dma.done.wait [#allocation3], 128  }
  0x15   :  { %269 = vsyncadd [#allocation3], 4294967168  ;;  %v275_v0 = vmov 0   ;;  %v276_v1 = vmov 2   ;;  %v29_v2 = vld [vmem:[#allocation2] sm:$0xff]  ;;  %v277_v3 = vmov 1  }
  0x16   :  { %215 = vset.pattern.permute.xlu0 %v275_v0  ;;  %217 = vset.pattern.permute.xlu1 %v276_v1  ;;  %v278_v4 = vmov 3   ;;  %vm47_vm0 = vcmask 261120   ;;  %vm49_vm1 = vcmask 523264   ;;  %vm51_vm2 = vcmask 785408   ;;  %v191_v10 = vld [vmem:[%s364_s1] ss:$0 sm:$0xff] }
  0x17   :  { %32 = vperm.xlu0 %215, %v29_v2   ;;  %40 = vperm.xlu1 %217, %v29_v2   ;;  %v192_v12 = vld [vmem:[%s365_s2] ss:$0 sm:$0xff]  ;;  %v279_v26 = vmov 683565275   ;;  %v280_v28 = vmov 2475754826  }
  0x18   :  { %v281_v31 = vmov 2131351028   ;;  %v282_v34 = vmov 2102212464   ;;  %v283_v37 = vmov 920167782  }
  0x19   :  { %v284_v40 = vmov 1326507024  }
  0x1b   :  { %216 = vset.pattern.permute.xlu0 %v277_v3  ;;  %218 = vset.pattern.permute.xlu1 %v278_v4 }
  0x1c   :  { %36 = vperm.xlu0 %216, %v29_v2   ;;  %44 = vperm.xlu1 %218, %v29_v2  }
  0x20   :  { %219 = vset.pattern.permute.xlu0 %v278_v4 }
  0x96   :  { %v33_v5 = vpop.permute.xlu0 %32  ;;  %v41_v6 = vpop.permute.xlu1 %40 }
  0x9b   :  { %v37_v7 = vpop.permute.xlu0 %36  ;;  %v45_v8 = vpop.permute.xlu1 %44 }
  0x9c   :  { %v48_v9 = vsel %vm47_vm0, %v33_v5, %v37_v7 }
  0x9d   :  { %v50_v11 = vsel %vm49_vm1, %v48_v9, %v41_v6 }
  0x9e   :  { %v52_v13 = vsel %vm51_vm2, %v50_v11, %v45_v8 }
  0x9f   :  { %v60_v14 = vmul.f32 %v191_v10, %v52_v13 }
  0xa1   :  { %v327_v15 = vadd.f32 %v192_v12, %v60_v14 }
  0xa3   :  { %v72_v16 = vand.u32 2139095040, %v327_v15  ;;  %v69_v20 = vand.u32 2147483647, %v327_v15  ;;  %vm71_vm10 = vcmp.lt.s32.totalorder %v327_v15, 0  ;;  %vm161_vm15 = vweird.f32 %v327_v15 }
  0xa5   :  { %v73_v17 = vshrl.u32 %v72_v16, 23  ;;  %v76_v23 = vand.u32 8388607, %v69_v20  ;;  %vm70_vm11 = vcmp.le.f32.partialorder %v69_v20, 0.7853982 }
  0xa7   :  { %v193_v18 = vadd.s32 4294967169, %v73_v17  ;;  %v77_v42 = vor.u32 8388608, %v76_v23 }
  0xa9   :  { %v79_v19 = vadd.s32 1, %v193_v18  ;;  %v117_v56 = vshll.u32 %v77_v42, 8 }
  0xab   :  { %vm80_vm3 = vcmp.gt.s32.totalorder %v79_v19, 0 }
  0xac   :  { %v81_v21 = vsel %vm80_vm3, %v79_v19, 0 }
  0xad   :  { %v83_v22 = vand.u32 31, %v81_v21  ;;  %v82_v25 = vshrl.u32 %v81_v21, 5 }
  0xaf   :  { %v84_v24 = vsub.s32 32, %v83_v22  ;;  %v86_v27 = vshll.u32 %v279_v26, %v83_v22  ;;  %v89_v29 = vshll.u32 %v280_v28, %v83_v22  ;;  %v92_v33 = vshll.u32 %v281_v31, %v83_v22 }
  0xb0   :  { %v95_v36 = vshll.u32 %v282_v34, %v83_v22  ;;  %v98_v39 = vshll.u32 %v283_v37, %v83_v22  ;;  %vm101_vm4 = vcmp.lt.s32.totalorder %v82_v25, 1  ;;  %vm104_vm5 = vcmp.lt.s32.totalorder %v82_v25, 4 }
  0xb1   :  { %v87_v30 = vshrl.u32 %v280_v28, %v84_v24  ;;  %v90_v32 = vshrl.u32 %v281_v31, %v84_v24  ;;  %v93_v35 = vshrl.u32 %v282_v34, %v84_v24  ;;  %v96_v38 = vshrl.u32 %v283_v37, %v84_v24 }
  0xb2   :  { %v99_v41 = vshrl.u32 %v284_v40, %v84_v24  ;;  %v85_v51 = vshrl.u32 %v279_v26, %v84_v24  ;;  %vm103_vm6 = vcmp.lt.s32.totalorder %v82_v25, 3  ;;  %vm102_vm7 = vcmp.lt.s32.totalorder %v82_v25, 2 }
  0xb3   :  { %v88_v43 = vor.u32 %v87_v30, %v86_v27  ;;  %v91_v44 = vor.u32 %v90_v32, %v89_v29  ;;  %v94_v45 = vor.u32 %v93_v35, %v92_v33  ;;  %v97_v46 = vor.u32 %v96_v38, %v95_v36 }
  0xb4   :  { %v100_v47 = vor.u32 %v99_v41, %v98_v39 }
  0xb5   :  { %v106_v48 = vsel %vm104_vm5, %v94_v45, 2102212464  ;;  %v109_v49 = vsel %vm101_vm4, %v88_v43, %v91_v44  ;;  %v113_v50 = vsel %vm101_vm4, %v91_v44, %v94_v45  ;;  %v110_v52 = vsel %vm104_vm5, %v97_v46, 920167782 }
  0xb6   :  { %v114_v53 = vsel %vm104_vm5, %v100_v47, 1326507024  ;;  %v111_v54 = vsel %vm103_vm6, %v94_v45, %v110_v52  ;;  %v105_v57 = vsel %vm101_vm4, %v85_v51, %v88_v43  ;;  %v107_v58 = vsel %vm103_vm6, %v91_v44, %v106_v48 }
  0xb7   :  { %v115_v55 = vsel %vm103_vm6, %v97_v46, %v114_v53  ;;  %v112_v59 = vsel %vm102_vm7, %v109_v49, %v111_v54  ;;  %v108_v1 = vsel %vm102_vm7, %v105_v57, %v107_v58 }
  0xb8   :  { %v116_v60 = vsel %vm102_vm7, %v113_v50, %v115_v55  ;;  %v336_v63 = vmul.u32.u64.low %v117_v56, %v112_v59  ;;  %v337_v0 = vmul.u32.u64.high %v117_v56, %v112_v59, %v336_v63  ;;  %v124_v3 = vmul.u32 %v117_v56, %v108_v1 }
  0xb9   :  { %v333_v61 = vmul.u32.u64.low %v117_v56, %v116_v60  ;;  %v334_v62 = vmul.u32.u64.high %v117_v56, %v116_v60, %v333_v61 }
  0xba   :  { %v127_v2 = vadd.s32 1, %v337_v0 }
  0xbb   :  { %vm126_vm8 = vc.u32 %v334_v62, %v336_v63  ;;  %v125_v16 = vadd.s32 %v336_v63, %v334_v62 }
  0xbc   :  { %v128_v4 = vsel %vm126_vm8, %v127_v2, %v337_v0 }
  0xbd   :  { %v129_v5 = vadd.s32 %v128_v4, %v124_v3 }
  0xbf   :  { %v130_v6 = vadd.s32 536870912, %v129_v5 }
  0xc1   :  { %v131_v7 = vshrl.u32 %v130_v6, 30 }
  0xc3   :  { %v132_v8 = vshll.u32 %v131_v7, 30  ;;  %v155_v29 = vsub.s32 4, %v131_v7 }
  0xc5   :  { %v133_v9 = vsub.s32 %v129_v5, %v132_v8  ;;  %v156_v32 = vsel %vm71_vm10, %v155_v29, %v131_v7 }
  0xc6   :  { %v158_v34 = vsel %vm70_vm11, 0, %v156_v32 }
  0xc7   :  { %v135_v10 = vsub.s32 0, %v133_v9  ;;  %v162_v35 = vadd.s32 3, %v158_v34 }
  0xc9   :  { %v194_v11 = vmin.u32 %v135_v10, %v133_v9  ;;  %v163_v36 = vand.u32 3, %v162_v35 }
  0xcb   :  { %v137_v12 = vclz %v194_v11  ;;  %vm168_vm12 = vcmp.eq.s32.totalorder %v163_v36, 2  ;;  %vm165_vm13 = vcmp.eq.s32.totalorder %v163_v36, 0  ;;  %vm164_vm14 = vcmp.lt.s32.totalorder %v163_v36, 2 }
  0xcd   :  { %v195_v13 = vadd.s32 4294967294, %v137_v12 }
  0xcf   :  { %vm196_vm9 = vcmp.lt.s32.totalorder %v195_v13, 0 }
  0xd0   :  { %v140_v14 = vsel %vm196_vm9, 0, %v195_v13 }
  0xd1   :  { %v141_v17 = vsub.s32 32, %v140_v14  ;;  %v145_v18 = vsub.s32 4294967266, %v140_v14  ;;  %v142_v19 = vshll.u32 %v133_v9, %v140_v14 }
  0xd3   :  { %v143_v21 = vshrl.u32 %v125_v16, %v141_v17  ;;  %v146_v22 = vadd.s32 127, %v145_v18 }
  0xd5   :  { %v144_v23 = vor.u32 %v143_v21, %v142_v19  ;;  %v147_v24 = vshll.u32 %v146_v22, 23 }
  0xd7   :  { %v148_v25 = vor.u32 4788187, %v147_v24  ;;  %v151_v27 = vcvt.s32.f32 %v144_v23 }
  0xd9   :  { %v149_v26 = vand.u32 2147483647, %v148_v25 }
  0xdb   :  { %v152_v28 = vmul.f32 %v151_v27, %v149_v26 }
  0xdd   :  { %v153_v30 = vxor.u32 2147483648, %v152_v28 }
  0xdf   :  { %v154_v31 = vsel %vm71_vm10, %v153_v30, %v152_v28 }
  0xe0   :  { %v157_v33 = vsel %vm70_vm11, %v327_v15, %v154_v31 }
  0xe1   :  { %220 = vcosq.f32 %v157_v33 }
  0xe2   :  { %222 = vsinq.f32 %v157_v33 }
  0xeb   :  { %v221_v37 = vpop.eup %220 }
  0xec   :  { %v223_v38 = vpop.eup %222  ;;  %v169_v39 = vxor.u32 2147483648, %v221_v37 }
  0xed   :  { %v166_v40 = vxor.u32 2147483648, %v223_v38 }
  0xee   :  { %v170_v41 = vsel %vm168_vm12, %v169_v39, %v223_v38 }
  0xef   :  { %v167_v42 = vsel %vm165_vm13, %v221_v37, %v166_v40 }
  0xf0   :  { %v171_v20 = vsel %vm164_vm14, %v167_v42, %v170_v41 }
  0xf1   :  { %v172_v43 = vsel %vm161_vm15, nan, %v171_v20 }
  0xf2   :  { %173 = vst [vmem:[#allocation5] sm:$0xff] %v172_v43 }
  0xf3   :  { %178 = vsyncadd [#allocation4], 96  ;;  %s285_s1 = smov [#allocation5]  }
  0xf4   :  { %s179_s2 = sshll.u32 %s285_s1, 4  ;;  %s180_s2 = int_to_ptr.vmem [resolvable:$true] %s179_s2 }
  0xf5   :  { %s246_s30 = scalar_lea.vmem %s180_s2, 32  ;;  %s250_s4 = scalar_lea.vmem %s180_s2, 128 }
  0xf6   :  { %p247_p8 = scmp.ne.s32.totalorder %s180_s2, %s246_s30  ;;  %p251_p9 = scmp.lt.s32.totalorder %s180_s2, %s180_s2 }
  0xf7   :  { %p252_p10 = scmp.lt.s32.totalorder %s250_s4, %s246_s30 }
  0xf9   :  { %p253_p11 = por %p252_p10, %p251_p9 }
  0xfb   :  { %p254_p12 = pnand %p253_p11, %p247_p8 }
  0xfd   :  { %257 = shalt.err (!%p254_p12)
}
  0xfe   :  { %s258_s7 = scalar_lea.hbm %s366_s3, 32 }
  0xff   :  { %p259_p13 = scmp.ne.s32.totalorder %s366_s3, %s258_s7  ;;  %p262_p0 = scmp.lt.u32.totalorder %s258_s7, %s366_s3 }
 0x101   :  { %p264_p1 = pnand %p262_p0, %p259_p13 }
 0x103   :  { %267 = shalt.err (!%p264_p1)
}
 0x104   :  { %185 = dma.vmem_to_hbm [thread:$0]  %s180_s2, 32, %s366_s3, [#allocation4], %s273_s23, %s273_s23, %s274_s24  }
 0x105   :  { %270 = dma.done.wait [#allocation4], 128  }
 0x106   :  { %271 = vsyncadd [#allocation4], 4294967168 }
 0x107   :  { %189 = vsyncpa [#allocation3], 1 }
 0x108   :  { %190 = vsyncpa [#allocation4], 1 }

</bundles_post_ra>
